<compile_context>
chip_gen: v7x
topology: tpu7x:2x2x1
jax: 0.10.0
libtpu: 0.0.40
codegen_flags: <defaults>
</compile_context>

<pallas_src>
import functools

import jax
import jax.numpy as jnp
from jax.experimental import pallas as pl
from jax.experimental.pallas import tpu as pltpu

_LANES = 128
_SUBLANES = 8


def _cdiv(a: int, b: int) -> int:
    return (a + b - 1) // b


@functools.lru_cache(maxsize=1)
def _tpu_config():
    """Trace-time chip detection -> (#TCs per device, vmem limit, bf16 VALU)."""
    try:
        kind = jax.devices()[0].device_kind.lower()
    except Exception:  # pragma: no cover - non-TPU fallback
        kind = ""
    is_v7 = "v7" in kind
    is_v5e = ("v5e" in kind) or ("v5 lite" in kind) or ("v5litepod" in kind)
    # Chips exposing 2 TensorCores behind one device (megacore): v4 / v7x.
    num_tc = 2 if (is_v7 or "v4" in kind) else 1
    # Explicit scoped-VMEM budget: stay well under 64 MiB physical on v7x,
    # generous on 128 MiB chips (v5e default of 16 MiB is too small for 8 MiB
    # blocks).
    vmem_limit = (48 << 20) if is_v7 else (64 << 20)
    bf16_valu = not is_v5e  # v6e / v7x VALU is bf16-capable
    return num_tc, vmem_limit, bf16_valu


def _pairwise_loss_kernel(pos_ref, neg_ref, out_ref, *,
                          margin: float, n: int, tm: int,
                          tiles_per_core: int, total_tiles: int,
                          compute_dtype):
    c = pl.program_id(0)   # core (parallel) axis
    i = pl.program_id(1)   # row-tile (reduction) axis

    # Zero this core's resident accumulator block on its first tile.
    @pl.when(i == 0)
    def _():
        out_ref[...] = jnp.zeros_like(out_ref)

    tile = c * tiles_per_core + i   # nominal (unclamped) tile index

    def body(apply_mask: bool):
        pos = pos_ref[...].astype(compute_dtype)
        neg = neg_ref[...].astype(compute_dtype)
        hinge = jnp.maximum(
            jnp.asarray(margin, compute_dtype) - pos + neg,
            jnp.asarray(0, compute_dtype)).astype(jnp.float32)

        if apply_mask:
            # Row-index based mask (int32-safe): full rows are valid outright,
            # the single partial row gets a lane-level compare.
            full_rows = n // _LANES
            tail = n % _LANES
            grow = tile * tm + jax.lax.broadcasted_iota(
                jnp.int32, (tm, _LANES), 0)
            valid = grow < full_rows
            if tail:
                lane = jax.lax.broadcasted_iota(jnp.int32, (tm, _LANES), 1)
                valid = valid | ((grow == full_rows) & (lane < tail))
            hinge = jnp.where(valid, hinge, 0.0)

        # Reduce the (tm, 128) tile to one vreg-shaped (8, 128) partial with
        # pure VPU adds (reshape groups sublanes by 8, vreg-aligned).
        partial = hinge.reshape(tm // _SUBLANES, _SUBLANES, _LANES).sum(axis=0)
        out_ref[...] += partial[None]

    # Interior tiles: fully in-bounds, no mask work (keeps VALU light so the
    # kernel stays HBM-bound even at v7x bandwidth).
    @pl.when(tile < total_tiles - 1)
    def _():
        body(apply_mask=False)

    # Last nominal tile: mask tail lanes / out-of-range (Pallas-padded) rows.
    @pl.when(tile == total_tiles - 1)
    def _():
        body(apply_mask=True)

    # tile > total_tiles - 1 (clamped duplicate under the 2-core split):
    # skip compute entirely; the duplicated DMA contributes nothing.


@functools.partial(jax.jit, static_argnames=("margin", "max_tile_rows"))
def pairwise_loss(pos_scores: jax.Array, neg_scores: jax.Array,
                  margin: float, max_tile_rows: int | None = None):
    assert pos_scores.shape == neg_scores.shape
    pos = pos_scores.reshape(-1)
    neg = neg_scores.reshape(-1)
    n = pos.shape[0]
    if n == 0:
        return jnp.zeros((), jnp.float32)

    num_tc, vmem_limit, bf16_valu = _tpu_config()
    itemsize = pos.dtype.itemsize
    compute_dtype = (jnp.bfloat16
                     if (pos.dtype == jnp.bfloat16 and bf16_valu)
                     else jnp.float32)

    # Pad only the last partial row (< 128 elems); free when 128 | n.
    rows = _cdiv(n, _LANES)
    pad = rows * _LANES - n
    if pad:
        pos = jnp.pad(pos, (0, pad))
        neg = jnp.pad(neg, (0, pad))
    pos2 = pos.reshape(rows, _LANES)
    neg2 = neg.reshape(rows, _LANES)

    # Row tile: ~8 MiB per input block, clamped to the (8-rounded) array size.
    if max_tile_rows is None:
        target_rows = (8 * 1024 * 1024) // (_LANES * itemsize)
    else:
        target_rows = max_tile_rows
    target_rows = max(_SUBLANES, (target_rows // _SUBLANES) * _SUBLANES)
    rows8 = _cdiv(rows, _SUBLANES) * _SUBLANES
    tm = int(min(target_rows, rows8))

    total_tiles = _cdiv(rows, tm)
    # 2-way core split only on 2-TC chips with enough tiles to amortize a
    # possible duplicated (clamped) tile; single-TC chips run one clean grid.
    num_cores = 2 if (num_tc >= 2 and total_tiles >= 8) else 1
    tiles_per_core = _cdiv(total_tiles, num_cores)

    if num_cores == 1:
        def in_map(c, i):
            return (i, 0)
    else:
        def in_map(c, i):
            # Clamp so no block is fully out of bounds; the duplicated tile is
            # skipped in-kernel via its nominal index.
            return (jnp.minimum(c * tiles_per_core + i, total_tiles - 1), 0)

    kernel = functools.partial(
        _pairwise_loss_kernel,
        margin=float(margin), n=n, tm=tm,
        tiles_per_core=tiles_per_core, total_tiles=total_tiles,
        compute_dtype=compute_dtype)

    out = pl.pallas_call(
        kernel,
        out_shape=jax.ShapeDtypeStruct((num_cores, _SUBLANES, _LANES),
                                       jnp.float32),
        grid_spec=pltpu.PrefetchScalarGridSpec(
            num_scalar_prefetch=0,
            grid=(num_cores, tiles_per_core),
            in_specs=[
                pl.BlockSpec((tm, _LANES), in_map),
                pl.BlockSpec((tm, _LANES), in_map),
            ],
            out_specs=pl.BlockSpec((1, _SUBLANES, _LANES),
                                   lambda c, i: (c, 0, 0)),
        ),
        compiler_params=pltpu.CompilerParams(
            dimension_semantics=("parallel", "arbitrary"),
            vmem_limit_bytes=vmem_limit),
        cost_estimate=pl.CostEstimate(
            flops=4 * n,
            transcendentals=0,
            bytes_accessed=2 * rows * _LANES * itemsize
            + num_cores * _SUBLANES * _LANES * 4),
    )(pos2, neg2)

    # Tiny final reduce of the per-core (8, 128) partials in plain JAX.
    return jnp.sum(out)


if __name__ == "__main__":
    key = jax.random.PRNGKey(0)
    k1, k2, k3, k4 = jax.random.split(key, 4)
    margin = 1.0

    # Case 1: single tile, n not a multiple of 128 (exercises the boundary
    # tile's lane-tail mask path).
    n1 = 5000
    pos1 = jax.random.normal(k1, (n1,), dtype=jnp.float32)
    neg1 = jax.random.normal(k2, (n1,), dtype=jnp.float32)
    loss1 = pairwise_loss(pos1, neg1, margin)
    jax.block_until_ready(loss1)
    ref1 = jnp.sum(jnp.maximum(margin - pos1 + neg1, 0.0))
    assert jnp.allclose(loss1, ref1, rtol=1e-4, atol=1e-2), (loss1, ref1)

    # Case 2: small forced tile -> multi-tile grid with an odd tile count
    # (exercises interior fast-path tiles, the masked last tile, cross-tile
    # accumulation, and — on 2-TC chips — the clamped-duplicate skip).
    n2 = 80000
    pos2 = jax.random.normal(k3, (n2,), dtype=jnp.float32)
    neg2 = jax.random.normal(k4, (n2,), dtype=jnp.float32)
    loss2 = pairwise_loss(pos2, neg2, margin, max_tile_rows=128)
    jax.block_until_ready(loss2)
    ref2 = jnp.sum(jnp.maximum(margin - pos2 + neg2, 0.0))
    assert jnp.allclose(loss2, ref2, rtol=1e-4, atol=1e-2), (loss2, ref2)

    # Case 3: bf16 inputs (bf16 hinge on bf16-VALU chips, f32 elsewhere).
    pos3 = pos1.astype(jnp.bfloat16)
    neg3 = neg1.astype(jnp.bfloat16)
    loss3 = pairwise_loss(pos3, neg3, margin)
    jax.block_until_ready(loss3)
    ref3 = jnp.sum(jnp.maximum(
        margin - pos3.astype(jnp.float32) + neg3.astype(jnp.float32), 0.0))
    assert jnp.allclose(loss3, ref3, rtol=2e-2, atol=5.0), (loss3, ref3)

    print("KERNEL_OK")
</pallas_src>

<mosaic_0001>
module attributes {stable_mosaic.version = 11 : i64} {
  func.func @_pairwise_loss_kernel(%arg0: i32, %arg1: i32, %arg2: memref<40x128xf32, #tpu.memory_space<vmem>>, %arg3: memref<40x128xf32, #tpu.memory_space<vmem>>, %arg4: memref<1x8x128xf32, #tpu.memory_space<vmem>>) attributes {dimension_semantics = [#tpu.dimension_semantics<parallel>, #tpu.dimension_semantics<arbitrary>], iteration_bounds = array<i64: 1, 1>, scalar_prefetch = 0 : i64, scratch_operands = 0 : i64, tpu.core_type = #tpu.core_type<tc>, window_params = [{transform_indices = @transform_0, window_bounds = array<i64: 40, 128>}, {transform_indices = @transform_1, window_bounds = array<i64: 40, 128>}, {transform_indices = @transform_2, window_bounds = array<i64: 1, 8, 128>}]} {
    %c0_i32 = arith.constant 0 : i32
    %0 = arith.cmpi eq, %arg1, %c0_i32 : i32
    %1 = arith.extui %0 : i1 to i32
    %c0_i32_0 = arith.constant 0 : i32
    %2 = arith.cmpi ne, %1, %c0_i32_0 : i32
    scf.if %2 {
      %cst = arith.constant 0.000000e+00 : f32
      %11 = vector.broadcast %cst : f32 to vector<1x8x128xf32>
      %c0 = arith.constant 0 : index
      %c0_5 = arith.constant 0 : index
      %c0_6 = arith.constant 0 : index
      %12 = vector.load %arg4[%c0, %c0_5, %c0_6] : memref<1x8x128xf32, #tpu.memory_space<vmem>>, vector<1x8x128xf32>
      tpu.vector_store %arg4[%c0, %c0_5, %c0_6], %11 {strides = array<i32>} : memref<1x8x128xf32, #tpu.memory_space<vmem>>, vector<1x8x128xf32>,
    } else {
    }
    %c1_i32 = arith.constant 1 : i32
    %3 = arith.muli %arg0, %c1_i32 : i32
    %4 = arith.addi %3, %arg1 : i32
    %c0_i32_1 = arith.constant 0 : i32
    %5 = arith.cmpi slt, %4, %c0_i32_1 : i32
    %6 = arith.extui %5 : i1 to i32
    %c0_i32_2 = arith.constant 0 : i32
    %7 = arith.cmpi ne, %6, %c0_i32_2 : i32
    scf.if %7 {
      %c0 = arith.constant 0 : index
      %c0_5 = arith.constant 0 : index
      %11 = vector.load %arg2[%c0, %c0_5] : memref<40x128xf32, #tpu.memory_space<vmem>>, vector<40x128xf32>
      %c0_6 = arith.constant 0 : index
      %c0_7 = arith.constant 0 : index
      %12 = vector.load %arg3[%c0_6, %c0_7] : memref<40x128xf32, #tpu.memory_space<vmem>>, vector<40x128xf32>
      %cst = arith.constant 1.000000e+00 : f32
      %13 = vector.broadcast %cst : f32 to vector<40x128xf32>
      %14 = arith.subf %13, %11 : vector<40x128xf32>
      %15 = arith.addf %14, %12 : vector<40x128xf32>
      %cst_8 = arith.constant 0.000000e+00 : f32
      %16 = vector.broadcast %cst_8 : f32 to vector<40x128xf32>
      %17 = arith.maximumf %15, %16 : vector<40x128xf32>
      %18 = vector.shape_cast %17 : vector<40x128xf32> to vector<5x8x128xf32>
      %cst_9 = arith.constant dense<0.000000e+00> : vector<8x128xf32>
      %19 = vector.multi_reduction <add>, %18, %cst_9 [0] : vector<5x8x128xf32> to vector<8x128xf32>
      %c0_10 = arith.constant 0 : index
      %c0_11 = arith.constant 0 : index
      %c0_12 = arith.constant 0 : index
      %20 = vector.load %arg4[%c0_10, %c0_11, %c0_12] : memref<1x8x128xf32, #tpu.memory_space<vmem>>, vector<1x8x128xf32>
      %21 = vector.shape_cast %19 : vector<8x128xf32> to vector<1x8x128xf32>
      %22 = arith.addf %20, %21 : vector<1x8x128xf32>
      %c0_13 = arith.constant 0 : index
      %c0_14 = arith.constant 0 : index
      %c0_15 = arith.constant 0 : index
      %23 = vector.load %arg4[%c0_13, %c0_14, %c0_15] : memref<1x8x128xf32, #tpu.memory_space<vmem>>, vector<1x8x128xf32>
      tpu.vector_store %arg4[%c0_13, %c0_14, %c0_15], %22 {strides = array<i32>} : memref<1x8x128xf32, #tpu.memory_space<vmem>>, vector<1x8x128xf32>,
    } else {
    }
    %c0_i32_3 = arith.constant 0 : i32
    %8 = arith.cmpi eq, %4, %c0_i32_3 : i32
    %9 = arith.extui %8 : i1 to i32
    %c0_i32_4 = arith.constant 0 : i32
    %10 = arith.cmpi ne, %9, %c0_i32_4 : i32
    scf.if %10 {
      %c0 = arith.constant 0 : index
      %c0_5 = arith.constant 0 : index
      %11 = vector.load %arg2[%c0, %c0_5] : memref<40x128xf32, #tpu.memory_space<vmem>>, vector<40x128xf32>
      %c0_6 = arith.constant 0 : index
      %c0_7 = arith.constant 0 : index
      %12 = vector.load %arg3[%c0_6, %c0_7] : memref<40x128xf32, #tpu.memory_space<vmem>>, vector<40x128xf32>
      %cst = arith.constant 1.000000e+00 : f32
      %13 = vector.broadcast %cst : f32 to vector<40x128xf32>
      %14 = arith.subf %13, %11 : vector<40x128xf32>
      %15 = arith.addf %14, %12 : vector<40x128xf32>
      %cst_8 = arith.constant 0.000000e+00 : f32
      %16 = vector.broadcast %cst_8 : f32 to vector<40x128xf32>
      %17 = arith.maximumf %15, %16 : vector<40x128xf32>
      %c40_i32 = arith.constant 40 : i32
      %18 = arith.muli %4, %c40_i32 : i32
      %19 = tpu.iota {dimensions = array<i32: 0>} : vector<40x128xi32>
      %20 = vector.broadcast %18 : i32 to vector<40x128xi32>
      %21 = arith.addi %20, %19 : vector<40x128xi32>
      %c39_i32 = arith.constant 39 : i32
      %22 = vector.broadcast %c39_i32 : i32 to vector<40x128xi32>
      %23 = arith.cmpi slt, %21, %22 : vector<40x128xi32>
      %24 = tpu.iota {dimensions = array<i32: 1>} : vector<40x128xi32>
      %c39_i32_9 = arith.constant 39 : i32
      %25 = vector.broadcast %c39_i32_9 : i32 to vector<40x128xi32>
      %26 = arith.cmpi eq, %21, %25 : vector<40x128xi32>
      %c8_i32 = arith.constant 8 : i32
      %27 = vector.broadcast %c8_i32 : i32 to vector<40x128xi32>
      %28 = arith.cmpi slt, %24, %27 : vector<40x128xi32>
      %29 = arith.andi %26, %28 : vector<40x128xi1>
      %30 = arith.ori %23, %29 : vector<40x128xi1>
      %cst_10 = arith.constant 0.000000e+00 : f32
      %31 = vector.broadcast %cst_10 : f32 to vector<40x128xf32>
      %32 = arith.select %30, %17, %31 : vector<40x128xi1>, vector<40x128xf32>
      %33 = vector.shape_cast %32 : vector<40x128xf32> to vector<5x8x128xf32>
      %cst_11 = arith.constant dense<0.000000e+00> : vector<8x128xf32>
      %34 = vector.multi_reduction <add>, %33, %cst_11 [0] : vector<5x8x128xf32> to vector<8x128xf32>
      %c0_12 = arith.constant 0 : index
      %c0_13 = arith.constant 0 : index
      %c0_14 = arith.constant 0 : index
      %35 = vector.load %arg4[%c0_12, %c0_13, %c0_14] : memref<1x8x128xf32, #tpu.memory_space<vmem>>, vector<1x8x128xf32>
      %36 = vector.shape_cast %34 : vector<8x128xf32> to vector<1x8x128xf32>
      %37 = arith.addf %35, %36 : vector<1x8x128xf32>
      %c0_15 = arith.constant 0 : index
      %c0_16 = arith.constant 0 : index
      %c0_17 = arith.constant 0 : index
      %38 = vector.load %arg4[%c0_15, %c0_16, %c0_17] : memref<1x8x128xf32, #tpu.memory_space<vmem>>, vector<1x8x128xf32>
      tpu.vector_store %arg4[%c0_15, %c0_16, %c0_17], %37 {strides = array<i32>} : memref<1x8x128xf32, #tpu.memory_space<vmem>>, vector<1x8x128xf32>,
    } else {
    }
    return
  }
  func.func @transform_0(%arg0: i32, %arg1: i32) -> (i32, i32) {
    %c0_i32 = arith.constant 0 : i32
    %c0_i32_0 = arith.constant 0 : i32
    return %arg1, %c0_i32 : i32, i32
  }
  func.func @transform_1(%arg0: i32, %arg1: i32) -> (i32, i32) {
    %c0_i32 = arith.constant 0 : i32
    %c0_i32_0 = arith.constant 0 : i32
    return %arg1, %c0_i32 : i32, i32
  }
  func.func @transform_2(%arg0: i32, %arg1: i32) -> (i32, i32, i32) {
    %c0_i32 = arith.constant 0 : i32
    %c0_i32_0 = arith.constant 0 : i32
    %c0_i32_1 = arith.constant 0 : i32
    return %arg0, %c0_i32, %c0_i32_0 : i32, i32, i32
  }
}

</mosaic_0001>

<bundles_post_ra>
// kernel: pairwise_loss.1
= control target key start
LH: loop header
LB: loop body
LE: loop exit
PB: predicated region body
PF: predicated region fallthrough
CT: control target
= control target key end

     0   :  { %7 = vsyncpa [#allocation3], 0  ;;  %s311_s0 = inlined_call_operand.hbm [shape: f32[40,128], index: 0, kind: input, shape index: {}]   ;;  %s312_s1 = inlined_call_operand.hbm [shape: f32[40,128], index: 1, kind: input, shape index: {}]   ;;  %s313_s2 = inlined_call_operand.hbm [shape: f32[1,8,128], index: 2, kind: output, shape index: {}]  }
   0x1   :  { %8 = vsyncpa [#allocation6], 0 }
   0x2   :  { %9 = vsyncpa [#allocation4], 0  ;;  %s253_s9 = smov [#allocation2]   ;;  %s181_s13 = scalar_lea.hbm %s311_s0, 640 }
   0x3   :  { %s15_s10 = sshll.u32 %s253_s9, 4  ;;  %p182_p0 = scmp.ne.s32.totalorder %s311_s0, %s181_s13  ;;  %s16_s10 = int_to_ptr.vmem [resolvable:$true] %s15_s10 }
   0x4   :  { %p185_p1 = scmp.lt.u32.totalorder %s181_s13, %s311_s0 }
   0x6   :  { %p187_p2 = pnand %p185_p1, %p182_p0 }
   0x8   :  { %190 = shalt.err (!%p187_p2)
}
   0x9   :  { %s191_s18 = scalar_lea.vmem %s16_s10, 640  ;;  %p196_p4 = scmp.lt.s32.totalorder %s16_s10, %s16_s10 }
   0xa   :  { %p192_p3 = scmp.ne.s32.totalorder %s16_s10, %s191_s18  ;;  %p197_p5 = scmp.lt.s32.totalorder %s191_s18, %s191_s18 }
   0xc   :  { %p198_p6 = por %p197_p5, %p196_p4 }
   0xe   :  { %p199_p7 = pnand %p198_p6, %p192_p3 }
  0x10   :  { %202 = shalt.err (!%p199_p7)
}
  0x11   :  { %s254_s19 = smov 128   ;;  %s255_s20 = smov 8  }
  0x12   :  { %21 = dma.hbm_to_vmem [thread:$0]  %s311_s0, 640, %s16_s10, [#allocation3], %s254_s19, %s254_s19, %s255_s20  }
  0x13   :  { %s256_s23 = smov [#allocation5]   ;;  %s203_s27 = scalar_lea.hbm %s312_s1, 640 }
  0x14   :  { %s27_s24 = sshll.u32 %s256_s23, 4  ;;  %p204_p8 = scmp.ne.s32.totalorder %s312_s1, %s203_s27  ;;  %s28_s24 = int_to_ptr.vmem [resolvable:$true] %s27_s24 }
  0x15   :  { %p207_p9 = scmp.lt.u32.totalorder %s203_s27, %s312_s1 }
  0x17   :  { %p209_p10 = pnand %p207_p9, %p204_p8 }
  0x19   :  { %212 = shalt.err (!%p209_p10)
}
  0x1a   :  { %s213_s4 = scalar_lea.vmem %s28_s24, 640  ;;  %p218_p12 = scmp.lt.s32.totalorder %s28_s24, %s28_s24 }
  0x1b   :  { %p214_p11 = scmp.ne.s32.totalorder %s28_s24, %s213_s4  ;;  %p219_p13 = scmp.lt.s32.totalorder %s213_s4, %s213_s4 }
  0x1d   :  { %p220_p0 = por %p219_p13, %p218_p12 }
  0x1f   :  { %p221_p1 = pnand %p220_p0, %p214_p11 }
  0x21   :  { %224 = shalt.err (!%p221_p1)
}
  0x22   :  { %33 = dma.hbm_to_vmem [thread:$0]  %s312_s1, 640, %s28_s24, [#allocation6], %s254_s19, %s254_s19, %s255_s20  }
  0x23   :  { %247 = dma.done.wait [#allocation3], 640  }
  0x24   :  { %248 = vsyncadd [#allocation3], 4294966656 }
  0x25   :  { %249 = dma.done.wait [#allocation6], 640  }
  0x26   :  { %250 = vsyncadd [#allocation6], 4294966656  ;;  %v112_v0 = vlaneseq  ;;  %v86_v4 = vld [vmem:[#allocation2] sm:$0xff]  ;;  %v87_v5 = vld [vmem:[#allocation2 + $0x8] sm:$0xff]  ;;  %s257_s1 = smov [#allocation7]  }
  0x27   :  { %v88_v6 = vld [vmem:[#allocation2 + $0x10] sm:$0xff]  ;;  %v89_v7 = vld [vmem:[#allocation2 + $0x18] sm:$0xff]  ;;  %v90_v8 = vld [vmem:[#allocation2 + $0x20] sm:$0xff]  ;;  %v96_v10 = vsub.f32 1.0, %v86_v4  ;;  %v97_v11 = vsub.f32 1.0, %v87_v5  ;;  %s165_s6 = sshll.u32 %s257_s1, 4  ;;  %s166_s6 = int_to_ptr.vmem [resolvable:$true] %s165_s6 }
  0x28   :  { %v113_v1 = vshrl.u32 %v112_v0, 7  ;;  %v130_v2 = vand.u32 127, %v112_v0  ;;  %v91_v9 = vld [vmem:[#allocation5] sm:$0xff]  ;;  %v98_v12 = vsub.f32 1.0, %v88_v6  ;;  %v92_v13 = vld [vmem:[#allocation5 + $0x8] sm:$0xff]  ;;  %v93_v14 = vld [vmem:[#allocation5 + $0x10] sm:$0xff]  ;;  %p230_p3 = scmp.lt.s32.totalorder %s166_s6, %s166_s6 }
  0x29   :  { %v94_v15 = vld [vmem:[#allocation5 + $0x18] sm:$0xff]  ;;  %v99_v16 = vsub.f32 1.0, %v89_v7  ;;  %v100_v17 = vsub.f32 1.0, %v90_v8  ;;  %v95_v18 = vld [vmem:[#allocation5 + $0x20] sm:$0xff]  ;;  %v101_v19 = vadd.f32 %v96_v10, %v91_v9  ;;  %v102_v20 = vadd.f32 %v97_v11, %v92_v13  ;;  %s225_s7 = scalar_lea.vmem %s166_s6, 128 }
  0x2a   :  { %v117_v3 = vadd.s32 32, %v113_v1  ;;  %vm136_vm1 = vcmp.lt.s32.totalorder %v130_v2, 8  ;;  %v103_v21 = vadd.f32 %v98_v12, %v93_v14  ;;  %p226_p2 = scmp.ne.s32.totalorder %s166_s6, %s225_s7  ;;  %p231_p4 = scmp.lt.s32.totalorder %s225_s7, %s225_s7 }
  0x2b   :  { %v104_v22 = vadd.f32 %v99_v16, %v94_v15  ;;  %v105_v23 = vadd.f32 %v100_v17, %v95_v18  ;;  %v106_v24 = vmax.f32 %v101_v19, 0.0  ;;  %v107_v25 = vmax.f32 %v102_v20, 0.0 }
  0x2c   :  { %vm135_vm0 = vcmp.eq.s32.totalorder %v117_v3, 39  ;;  %vm128_vm2 = vcmp.lt.s32.totalorder %v117_v3, 39  ;;  %v108_v26 = vmax.f32 %v103_v21, 0.0  ;;  %p232_p5 = por %p231_p4, %p230_p3 }
  0x2d   :  { %vm141_vm3 = vmand %vm135_vm0, %vm136_vm1  ;;  %v110_v27 = vmax.f32 %v105_v23, 0.0  ;;  %v109_v28 = vmax.f32 %v104_v22, 0.0  ;;  %v152_v29 = vadd.f32 %v107_v25, %v106_v24 }
  0x2e   :  { %vm146_vm4 = vmor %vm128_vm2, %vm141_vm3  ;;  %p233_p6 = pnand %p232_p5, %p226_p2 }
  0x2f   :  { %v153_v30 = vadd.f32 %v152_v29, %v108_v26  ;;  %v151_v31 = vsel %vm146_vm4, %v110_v27, 0.0 }
  0x31   :  { %v154_v32 = vadd.f32 %v153_v30, %v109_v28 }
  0x33   :  { %v155_v33 = vadd.f32 %v154_v32, %v151_v31 }
  0x35   :  { %158 = vst [vmem:[#allocation7] sm:$0xff] %v155_v33 }
  0x36   :  { %236 = shalt.err (!%p233_p6)
}
  0x37   :  { %s237_s10 = scalar_lea.hbm %s313_s2, 128 }
  0x38   :  { %p238_p7 = scmp.ne.s32.totalorder %s313_s2, %s237_s10  ;;  %p241_p8 = scmp.lt.u32.totalorder %s237_s10, %s313_s2 }
  0x3a   :  { %p243_p9 = pnand %p241_p8, %p238_p7 }
  0x3c   :  { %246 = shalt.err (!%p243_p9)
}
  0x3d   :  { %168 = dma.vmem_to_hbm [thread:$0]  %s166_s6, 128, %s313_s2, [#allocation4]  }
  0x3e   :  { %251 = dma.done.wait [#allocation4], 128  }
  0x3f   :  { %252 = vsyncadd [#allocation4], 4294967168 }
  0x40   :  { %172 = vsyncpa [#allocation3], 1 }
  0x41   :  { %173 = vsyncpa [#allocation6], 1 }
  0x42   :  { %174 = vsyncpa [#allocation4], 1 }

</bundles_post_ra>
